<compile_context>
chip_gen: v6e
topology: v6e:2x2x1
jax: 0.10.0
libtpu: 0.0.40
codegen_flags: <defaults>
</compile_context>

<pallas_src>
import jax
import jax.numpy as jnp
from jax.experimental import pallas as pl
from jax.experimental.pallas import tpu as pltpu


def _spatial_attn_kernel(x_ref, w_ref, o_ref):
    # x_ref: (1, C, T) tile (one batch element, one spatial tile).
    x = x_ref[...].astype(jnp.float32)              # (1, C, T) f32 compute
    mx = jnp.max(x, axis=1, keepdims=True)          # (1, 1, T)
    mn = jnp.mean(x, axis=1, keepdims=True)         # (1, 1, T)

    w = w_ref[...]                                  # (C, 3) f32 [w_max, w_mean, bias]
    w0 = w[:, 0:1][None]                            # (1, C, 1)
    w1 = w[:, 1:2][None]
    bb = w[:, 2:3][None]

    # 1x1 conv (2 -> C) + ReLU, broadcast over lanes (spatial).
    attn = jnp.maximum(w0 * mx + w1 * mn + bb, 0.0)  # (1, C, T)

    # fusion='scale' followed by sigmoid (tanh form -> EUP slot).
    z = x * attn
    o_ref[...] = (0.5 * (jnp.tanh(0.5 * z) + 1.0)).astype(o_ref.dtype)


def spatial_attention1(x_nchw, conv_w, conv_b):
    """x_nchw: (B, C, H, W).  conv_w: (C, 2, 1, 1).  conv_b: (C,)."""
    B, C, H, W = x_nchw.shape
    HW = H * W
    in_dtype = x_nchw.dtype
    itemsize = jnp.dtype(in_dtype).itemsize

    x = x_nchw.reshape(B, C, HW)

    # ---- spatial tile selection --------------------------------------------
    # Budget ~2 MiB per input tile => 4x double-buffered (in+out) tiles stay
    # around 8 MiB, comfortably inside every generation's scoped VMEM.
    t_cap = (2 * 1024 * 1024) // max(1, C * itemsize)
    t_cap = max(128, min(8192, (t_cap // 128) * 128))
    num_t = -(-HW // t_cap)                       # ceil-div: number of HW tiles
    T = ((-(-HW // num_t)) + 127) // 128 * 128    # per-tile lanes, mult. of 128
    HW_pad = num_t * T
    if HW_pad != HW:
        # Lane padding: reductions are over C (sublanes), so padded lanes never
        # contaminate real outputs; they are sliced off below.
        x = jnp.pad(x, ((0, 0), (0, 0), (0, HW_pad - HW)))

    # Pack per-channel conv params into one (C, 3) operand: [w_max, w_mean, b].
    wcb = jnp.stack(
        [conv_w[:, 0, 0, 0], conv_w[:, 1, 0, 0], conv_b], axis=1
    ).astype(jnp.float32)

    out = pl.pallas_call(
        _spatial_attn_kernel,
        out_shape=jax.ShapeDtypeStruct((B, C, HW_pad), in_dtype),
        grid_spec=pltpu.PrefetchScalarGridSpec(
            num_scalar_prefetch=0,
            grid=(B, num_t),
            in_specs=[
                pl.BlockSpec((1, C, T), lambda b, t: (b, 0, t)),
                pl.BlockSpec((C, 3), lambda b, t: (0, 0)),
            ],
            out_specs=pl.BlockSpec((1, C, T), lambda b, t: (b, 0, t)),
        ),
        compiler_params=pltpu.CompilerParams(
            dimension_semantics=("parallel", "parallel"),
            vmem_limit_bytes=32 * 1024 * 1024,
        ),
    )(x, wcb)

    if HW_pad != HW:
        out = out[:, :, :HW]
    return out.reshape(B, C, H, W)


def _reference(x, conv_w, conv_b):
    # Pure-JAX reference mirroring the PyTorch forward.
    xf = x.astype(jnp.float32)
    mx = jnp.max(xf, axis=1, keepdims=True)
    mn = jnp.mean(xf, axis=1, keepdims=True)
    w0 = conv_w[:, 0, 0, 0][None, :, None, None]
    w1 = conv_w[:, 1, 0, 0][None, :, None, None]
    bb = conv_b[None, :, None, None]
    attn = jnp.maximum(w0 * mx + w1 * mn + bb, 0.0)
    return jax.nn.sigmoid(xf * attn).astype(x.dtype)


if __name__ == "__main__":
    key = jax.random.PRNGKey(0)
    k_x, k_w, k_b, k_x2 = jax.random.split(key, 4)

    # Primary small test: B=2, C=4, H=W=16 (dim = C = 4).
    B, C, H, W = 2, 4, 16, 16
    x = jax.random.normal(k_x, (B, C, H, W), dtype=jnp.float32)
    conv_w = jax.random.normal(k_w, (C, 2, 1, 1), dtype=jnp.float32) * 0.5
    conv_b = jax.random.normal(k_b, (C,), dtype=jnp.float32) * 0.1

    out = spatial_attention1(x, conv_w, conv_b)
    out = jax.block_until_ready(out)
    ref = _reference(x, conv_w, conv_b)
    assert jnp.allclose(out, ref, atol=1e-5, rtol=1e-5), "mismatch vs reference"

    # Secondary test: H*W not a multiple of 128 -> exercises lane padding path.
    x2 = jax.random.normal(k_x2, (B, C, 7, 7), dtype=jnp.float32)
    out2 = jax.block_until_ready(spatial_attention1(x2, conv_w, conv_b))
    ref2 = _reference(x2, conv_w, conv_b)
    assert jnp.allclose(out2, ref2, atol=1e-5, rtol=1e-5), "mismatch (padded HW)"

    print("KERNEL_OK")
</pallas_src>

<mosaic_0001>
module attributes {stable_mosaic.version = 11 : i64} {
  func.func @_spatial_attn_kernel(%arg0: i32, %arg1: i32, %arg2: memref<1x4x256xf32, #tpu.memory_space<vmem>>, %arg3: memref<4x3xf32, #tpu.memory_space<vmem>>, %arg4: memref<1x4x256xf32, #tpu.memory_space<vmem>>) attributes {dimension_semantics = [#tpu.dimension_semantics<parallel>, #tpu.dimension_semantics<parallel>], iteration_bounds = array<i64: 2, 1>, scalar_prefetch = 0 : i64, scratch_operands = 0 : i64, tpu.core_type = #tpu.core_type<tc>, window_params = [{transform_indices = @transform_0, window_bounds = array<i64: 1, 4, 256>}, {pipeline_mode = #tpu.pipeline_mode<synchronous>, transform_indices = @transform_1, window_bounds = array<i64: 4, 3>}, {transform_indices = @transform_2, window_bounds = array<i64: 1, 4, 256>}]} {
    %c0 = arith.constant 0 : index
    %c0_0 = arith.constant 0 : index
    %c0_1 = arith.constant 0 : index
    %0 = vector.load %arg2[%c0, %c0_0, %c0_1] : memref<1x4x256xf32, #tpu.memory_space<vmem>>, vector<1x4x256xf32>
    %cst = arith.constant dense<0xFF800000> : vector<1x256xf32>
    %1 = vector.multi_reduction <maximumf>, %0, %cst [1] : vector<1x4x256xf32> to vector<1x256xf32>
    %2 = vector.shape_cast %1 : vector<1x256xf32> to vector<1x1x256xf32>
    %cst_2 = arith.constant dense<0.000000e+00> : vector<1x256xf32>
    %3 = vector.multi_reduction <add>, %0, %cst_2 [1] : vector<1x4x256xf32> to vector<1x256xf32>
    %4 = vector.shape_cast %3 : vector<1x256xf32> to vector<1x1x256xf32>
    %cst_3 = arith.constant 4.000000e+00 : f32
    %5 = vector.broadcast %cst_3 : f32 to vector<1x1x256xf32>
    %6 = arith.divf %4, %5 : vector<1x1x256xf32>
    %c0_4 = arith.constant 0 : index
    %c0_5 = arith.constant 0 : index
    %7 = vector.load %arg3[%c0_4, %c0_5] : memref<4x3xf32, #tpu.memory_space<vmem>>, vector<4x3xf32>
    %8 = vector.extract_strided_slice %7 {offsets = [0, 0], sizes = [4, 1], strides = [1, 1]} : vector<4x3xf32> to vector<4x1xf32>
    %9 = vector.shape_cast %8 : vector<4x1xf32> to vector<1x4x1xf32>
    %10 = vector.extract_strided_slice %7 {offsets = [0, 1], sizes = [4, 1], strides = [1, 1]} : vector<4x3xf32> to vector<4x1xf32>
    %11 = vector.shape_cast %10 : vector<4x1xf32> to vector<1x4x1xf32>
    %12 = vector.extract_strided_slice %7 {offsets = [0, 2], sizes = [4, 1], strides = [1, 1]} : vector<4x3xf32> to vector<4x1xf32>
    %13 = vector.shape_cast %12 : vector<4x1xf32> to vector<1x4x1xf32>
    %14 = vector.broadcast %9 : vector<1x4x1xf32> to vector<1x4x256xf32>
    %15 = vector.broadcast %2 : vector<1x1x256xf32> to vector<1x4x256xf32>
    %16 = arith.mulf %14, %15 : vector<1x4x256xf32>
    %17 = vector.broadcast %11 : vector<1x4x1xf32> to vector<1x4x256xf32>
    %18 = vector.broadcast %6 : vector<1x1x256xf32> to vector<1x4x256xf32>
    %19 = arith.mulf %17, %18 : vector<1x4x256xf32>
    %20 = arith.addf %16, %19 : vector<1x4x256xf32>
    %21 = vector.broadcast %13 : vector<1x4x1xf32> to vector<1x4x256xf32>
    %22 = arith.addf %20, %21 : vector<1x4x256xf32>
    %cst_6 = arith.constant 0.000000e+00 : f32
    %23 = vector.broadcast %cst_6 : f32 to vector<1x4x256xf32>
    %24 = arith.maximumf %22, %23 : vector<1x4x256xf32>
    %25 = arith.mulf %0, %24 : vector<1x4x256xf32>
    %cst_7 = arith.constant 5.000000e-01 : f32
    %26 = vector.broadcast %cst_7 : f32 to vector<1x4x256xf32>
    %27 = arith.mulf %26, %25 : vector<1x4x256xf32>
    %28 = math.tanh %27 : vector<1x4x256xf32>
    %cst_8 = arith.constant 1.000000e+00 : f32
    %29 = vector.broadcast %cst_8 : f32 to vector<1x4x256xf32>
    %30 = arith.addf %28, %29 : vector<1x4x256xf32>
    %cst_9 = arith.constant 5.000000e-01 : f32
    %31 = vector.broadcast %cst_9 : f32 to vector<1x4x256xf32>
    %32 = arith.mulf %31, %30 : vector<1x4x256xf32>
    %c0_10 = arith.constant 0 : index
    %c0_11 = arith.constant 0 : index
    %c0_12 = arith.constant 0 : index
    %33 = vector.load %arg4[%c0_10, %c0_11, %c0_12] : memref<1x4x256xf32, #tpu.memory_space<vmem>>, vector<1x4x256xf32>
    tpu.vector_store %arg4[%c0_10, %c0_11, %c0_12], %32 {strides = array<i32>} : memref<1x4x256xf32, #tpu.memory_space<vmem>>, vector<1x4x256xf32>,
    return
  }
  func.func @transform_0(%arg0: i32, %arg1: i32) -> (i32, i32, i32) {
    %c0_i32 = arith.constant 0 : i32
    %c0_i32_0 = arith.constant 0 : i32
    return %arg0, %c0_i32, %arg1 : i32, i32, i32
  }
  func.func @transform_1(%arg0: i32, %arg1: i32) -> (i32, i32) {
    %c0_i32 = arith.constant 0 : i32
    %c0_i32_0 = arith.constant 0 : i32
    %c0_i32_1 = arith.constant 0 : i32
    return %c0_i32, %c0_i32_0 : i32, i32
  }
  func.func @transform_2(%arg0: i32, %arg1: i32) -> (i32, i32, i32) {
    %c0_i32 = arith.constant 0 : i32
    %c0_i32_0 = arith.constant 0 : i32
    return %arg0, %c0_i32, %arg1 : i32, i32, i32
  }
}

</mosaic_0001>

<bundles_post_ra>
// kernel: tpu_custom_call.1
= control target key start
LH: loop header
LB: loop body
LE: loop exit
PB: predicated region body
PF: predicated region fallthrough
CT: control target
= control target key end

     0   :  { %7 = vsyncpa [#allocation3], 0  ;;  %s802_s0 = inlined_call_operand.hbm [shape: f32[2,4,256], index: 0, kind: input, shape index: {}]   ;;  %s803_s1 = inlined_call_operand.hbm [shape: f32[4,3], index: 1, kind: input, shape index: {}]   ;;  %s804_s2 = inlined_call_operand.hbm [shape: f32[2,4,256], index: 2, kind: output, shape index: {}]  }
   0x1   :  { %9 = vsyncpa [#allocation3 + $0x1], 0 }
   0x2   :  { %10 = vsyncpa [#allocation6], 0 }
   0x3   :  { %11 = vsyncpa [#allocation4], 0 }
   0x4   :  { %13 = vsyncpa [#allocation4 + $0x1], 0  ;;  %s637_s9 = smov 0   ;;  %s639_s10 = smov 0  }
   0x5   :  { %s641_s11 = smov 0   ;;  %s643_s12 = smov 0  }
   0x6   :  { %s645_s13 = smov 0   ;;  %s647_s14 = smov 0  }
   0x7 LB: > { %s374_s15 = sadd.s32 4294967295, %s614_s14   ;;  %s375_s16 = sadd.s32 4294967294, %s614_s14   ;;  %s614_s14 = sphi %s647_s14, %s19_s14   ;;  %s610_s13 = sphi %s645_s13, %s821_s13   ;;  %s606_s12 = sphi %s643_s12, %s820_s12   ;;  %s602_s11 = sphi %s641_s11, %s819_s11   ;;  %s598_s10 = sphi %s639_s10, %s818_s10   ;;  %s594_s9 = sphi %s637_s9, %s817_s9  }
   0x8   : > { %p53_p0 = scmp.ne.s32.totalorder %s598_s10, %s594_s9  ;;  %p671_p1 = scmp.eq.s32.totalorder %s374_s15, 0 }
   0x9   : > { %p675_p2 = scmp.eq.s32.totalorder %s374_s15, 1  ;;  %p106_p3 = scmp.eq.s32.totalorder %s375_s16, 1 }
   0xa   : > { %p681_p4 = por %p671_p1, %p53_p0  ;;  %p376_p5 = scmp.ge.s32.totalorder %s614_s14, 1 }
   0xb   : > { %p686_p6 = por %p106_p3, %p53_p0  ;;  %p113_p7 = scmp.lt.s32.totalorder %s614_s14, 3 }
   0xc   : > { %s808_s19 = scalar_select %p681_p4, 1, 0 }
   0xd   : > { %s809_s20 = scalar_select %p686_p6, 1, 0 }
   0xe   : > { %p691_p8 = pnand %p376_p5, %p113_p7  ;;  %s616_s22 = smov [#allocation5]  }
   0xf   : > { %s126_s23 = sshll.u32 %s616_s22, 4  ;;  %s31_s25 = sadd.s32 1, %s610_s13  ;;  %s127_s23 = int_to_ptr.vmem [resolvable:$true] %s126_s23 }
  0x10   : > { %p401_p10 = pneg %p691_p8  ;;  %s40_s26 = sadd.s32 1, %s602_s11 }
  0x11   : > { %p33_p12 = scmp.ge.s32.totalorder %s31_s25, 2  ;;  %s487_s27 = scalar_lea.vmem %s127_s23, 64 }
  0x12   : > { %p700_p11 = pnand %p401_p10, %p671_p1  ;;  %p488_p0 = scmp.ne.s32.totalorder %s127_s23, %s487_s27 }
  0x13   : > { %p495_p7 = scmp.lt.s32.totalorder %s127_s23, %s127_s23  ;;  %p496_p6 = scmp.lt.s32.totalorder %s487_s27, %s487_s27 }
  0x14   : > { %p478_p13 = pneg %p700_p11 }
  0x15   : > { %p497_p9 = por %p496_p6, %p495_p7 }
  0x16   : > { %p490_p3 = pnand %p488_p0, %p478_p13 }
  0x18   : > { %p491_p5 = pneg %p490_p3 }
  0x1a   : > { %p498_p4 = pnand %p497_p9, %p491_p5 }
  0x1c   : > { %501 = shalt.err (!%p498_p4)
}
  0x1d   : > { %404 = dma.hbm_to_vmem [thread:$0]  (!%p700_p11), %s803_s1, 64, %s127_s23, [#allocation6]  }
  0x1e   : > { %s823_s25 = smov (%p33_p12, %s31_s25), 0  ;;  %p47_p6 = scmp.ne.s32.totalorder %s602_s11, %s598_s10 }
  0x1f   : > { %p48_p4 = scmp.eq.s32.totalorder %s614_s14, 0  ;;  %s35_s30 = ssub.s32 %s610_s13, %s823_s25 }
  0x20   : > { %p414_p9 = scmp.lt.s32.totalorder %s614_s14, 2  ;;  %p38_p10 = scmp.eq.s32.totalorder %s35_s30, 0 }
  0x21   : > { %p49_p13 = por %p48_p4, %p47_p6  ;;  %p723_p0 = por %p675_p2, %p47_p6 }
  0x22   : > { %s137_s4 = sand.u32 1, %s602_s11   ;;  %s391_s7 = sshll.u32 %s610_s13, 7 }
  0x23   : > { %s729_s5 = scalar_select %p38_p10, %s602_s11, %s40_s26  }
  0x24   : > { %s379_s6 = sshll.u32 %s137_s4, 3  ;;  %s149_s16 = scalar_lea.hbm %s802_s0, %s391_s7 }
  0x25   : > { %s141_s22 = scalar_lea.vmem [#allocation2], %s379_s6  ;;  %p735_p11 = pnand %p414_p9, %p49_p13 }
  0x26   : > { %s151_s23 = sshll.u32 %s141_s22, 4  ;;  %s138_s18 = scalar_lea.sflag [#allocation3], %s137_s4  ;;  %s152_s23 = int_to_ptr.vmem [resolvable:$true] %s151_s23 }
  0x27   : > { %p504_p2 = pneg %p735_p11  ;;  %s515_s27 = scalar_lea.vmem %s152_s23, 128 }
  0x28   : > { %p516_p12 = scmp.ne.s32.totalorder %s152_s23, %s515_s27  ;;  %s617_s26 = smov [#allocation2]  }
  0x29   : > { %s520_s28 = sshll.u32 %s617_s26, 4  ;;  %s521_s28 = int_to_ptr.vmem [resolvable:$false] %s520_s28 }
  0x2a   : > { %p518_p3 = pnand %p516_p12, %p504_p2  ;;  %s522_s29 = scalar_lea.vmem %s521_s28, 256 }
  0x2b   : > { %p523_p7 = scmp.lt.s32.totalorder %s152_s23, %s521_s28  ;;  %p524_p6 = scmp.lt.s32.totalorder %s522_s29, %s515_s27 }
  0x2c   : > { %p519_p5 = pneg %p518_p3 }
  0x2d   : > { %p525_p4 = por %p524_p6, %p523_p7 }
  0x2f   : > { %p526_p10 = pnand %p525_p4, %p519_p5 }
  0x31   : > { %529 = shalt.err (!%p526_p10)
}
  0x32   : > { %408 = dma.hbm_to_vmem [thread:$0]  (!%p735_p11), %s149_s16, 128, %s152_s23, %s138_s18  }
  0x33   : > { %160 = sbr.rel (%p691_p8) target bundleno = 235 (0xeb), region = 28  ;;  %s746_s30 = sand.u32 (!%p691_p8), 1, %s598_s10  }
  0x34   : > { %s383_s4 = sshll.u32 (!%p691_p8), %s746_s30, 3  ;;  %s163_s6 = scalar_lea.sflag (!%p691_p8), [#allocation3], %s746_s30 }
  0x35   : > { %s166_s7 = scalar_lea.vmem (!%p691_p8), [#allocation2], %s383_s4  ;;  %p814_p9 = scmp.ne.s32.totalorder (!%p691_p8), %s808_s19, 0 }
  0x38   : > { %581 = dma.done.wait (%p814_p9), %s163_s6, 128  }
  0x39   : > { %583 = vsyncadd (%p814_p9), %s163_s6, 4294967168 }
  0x3a   : > { %585 = dma.done.wait (%p671_p1), [#allocation6], 64  }
  0x3b   : > { %587 = vsyncadd (%p671_p1), [#allocation6], 4294967232  ;;  %v618_v0 = vmov 0   ;;  %v619_v1 = vmov 2   ;;  %v229_v2 = vld [vmem:[#allocation5] sm:$0xf] }
  0x3c   : > { %469 = vset.pattern.permute.xlu0 %v618_v0  ;;  %471 = vset.pattern.permute.xlu1 %v619_v1  ;;  %v620_v3 = vmov 1   ;;  %v193_v4 = vld [vmem:[%s166_s7] sm:$0xff]  ;;  %vm197_vm0 = vcmask 1043456   ;;  %s392_s17 = sshll.u32 %s606_s12, 7  ;;  %s190_s19 = scalar_lea.vmem [#allocation7], %s383_s4 }
  0x3d   : > { %232 = vperm.xlu0 %469, %v229_v2   ;;  %246 = vperm.xlu1 %471, %v229_v2   ;;  %v195_v5 = vcombine.high %v193_v4, %v193_v4  ;;  %v212_v6 = vsel %vm197_vm0, %v193_v4, 0.0  ;;  %v198_v10 = vsel %vm197_vm0, %v193_v4, -inf  ;;  %s280_s21 = sshll.u32 %s190_s19, 4  ;;  %s278_s16 = scalar_lea.hbm %s804_s2, %s392_s17  ;;  %s281_s21 = int_to_ptr.vmem [resolvable:$true] %s280_s21 }
  0x3e   : > { %v213_v8 = vrot.slane %v212_v6, 4  ;;  %v199_v12 = vrot.slane %v198_v10, 4  ;;  %s264_s22 = scalar_lea.sflag [#allocation4], %s746_s30  ;;  %s530_s23 = scalar_lea.vmem %s281_s21, 128 }
  0x3f   : > { %v219_v7 = vsel %vm197_vm0, %v195_v5, 0.0  ;;  %v205_v11 = vsel %vm197_vm0, %v195_v5, -inf  ;;  %p531_p1 = scmp.ne.s32.totalorder %s281_s21, %s530_s23  ;;  %s621_s24 = smov [#allocation7]  }
  0x40   : > { %v220_v9 = vrot.slane %v219_v7, 4  ;;  %v206_v13 = vrot.slane %v205_v11, 4  ;;  %v214_v14 = vadd.f32 %v213_v8, %v212_v6  ;;  %v200_v16 = vmax.f32 %v198_v10, %v199_v12  ;;  %s534_s18 = sshll.u32 %s621_s24, 4  ;;  %s535_s18 = int_to_ptr.vmem [resolvable:$false] %s534_s18 }
  0x41   : > { %470 = vset.pattern.permute.xlu0 %v620_v3  ;;  %p532_p8 = pnand %p531_p1, %p723_p0  ;;  %s536_s12 = scalar_lea.vmem %s535_s18, 256 }
  0x42   : > { %238 = vperm.xlu0 %470, %v229_v2   ;;  %v221_v15 = vadd.f32 %v220_v9, %v219_v7  ;;  %v207_v17 = vmax.f32 %v205_v11, %v206_v13  ;;  %v215_v18 = vrot.slane %v214_v14, 2  ;;  %v201_v20 = vrot.slane %v200_v16, 2  ;;  %p537_p11 = scmp.lt.s32.totalorder %s281_s21, %s535_s18  ;;  %p538_p2 = scmp.lt.s32.totalorder %s536_s12, %s530_s23 }
  0x43   : > { %p533_p13 = pneg %p532_p8 }
  0x44   : > { %v222_v19 = vrot.slane %v221_v15, 2  ;;  %v208_v21 = vrot.slane %v207_v17, 2  ;;  %v216_v22 = vadd.f32 %v215_v18, %v214_v14  ;;  %v202_v24 = vmax.f32 %v200_v16, %v201_v20  ;;  %p539_p12 = por %p538_p2, %p537_p11 }
  0x46   : > { %472 = vset.pattern.permute.xlu0 %v619_v1  ;;  %v223_v23 = vadd.f32 %v222_v19, %v221_v15  ;;  %v209_v25 = vmax.f32 %v207_v17, %v208_v21  ;;  %v217_v26 = vrot.slane %v216_v22, 1  ;;  %v203_v28 = vrot.slane %v202_v24, 1  ;;  %p540_p3 = pnand %p539_p12, %p533_p13 }
  0x48   : > { %v224_v27 = vrot.slane %v223_v23, 1  ;;  %v210_v29 = vrot.slane %v209_v25, 1  ;;  %v218_v30 = vadd.f32 %v217_v26, %v216_v22  ;;  %v204_v33 = vmax.f32 %v202_v24, %v203_v28 }
  0x4a   : > { %v225_v31 = vadd.f32 %v224_v27, %v223_v23  ;;  %v211_v34 = vmax.f32 %v209_v25, %v210_v29  ;;  %v227_v35 = vmul.f32 0.25, %v218_v30 }
  0x4c   : > { %v228_v36 = vmul.f32 0.25, %v225_v31 }
  0xb8   : > { %v233_v32 = vpop.permute.xlu0 %232  ;;  %v247_v42 = vpop.permute.xlu1 %246 }
  0xb9   : > { %v235_v38 = vmul.f32 %v233_v32, %v204_v33  ;;  %v236_v39 = vmul.f32 %v233_v32, %v211_v34 }
  0xbd   : > { %v239_v37 = vpop.permute.xlu0 %238 }
  0xbe   : > { %v241_v40 = vmul.f32 %v239_v37, %v227_v35  ;;  %v242_v41 = vmul.f32 %v239_v37, %v228_v36 }
  0xc0   : > { %v243_v43 = vadd.f32 %v241_v40, %v235_v38  ;;  %v244_v44 = vadd.f32 %v242_v41, %v236_v39 }
  0xc2   : > { %v249_v45 = vadd.f32 %v247_v42, %v243_v43  ;;  %v250_v46 = vadd.f32 %v247_v42, %v244_v44 }
  0xc4   : > { %v251_v47 = vmax.f32 %v249_v45, 0.0  ;;  %v252_v48 = vmax.f32 %v250_v46, 0.0 }
  0xc6   : > { %v255_v49 = vcombine.low %v251_v47, %v252_v48 }
  0xc8   : > { %v257_v50 = vmul.f32 %v255_v49, %v193_v4 }
  0xca   : > { %v258_v51 = vmul.f32 0.5, %v257_v50 }
  0xcc   : > { %474 = vtanh.f32 %v258_v51 }
  0xd9   : > { %v475_v52 = vpop.eup %474 }
  0xda   : > { %v260_v53 = vadd.f32 1.0, %v475_v52 }
  0xdc   : > { %v261_v54 = vmul.f32 0.5, %v260_v53 }
  0xde   : > { %262 = vst [vmem:[%s190_s19] sm:$0xff] %v261_v54 }
  0xdf   : > { %543 = shalt.err (!%p540_p3)
}
  0xe0   : > { %s544_s27 = scalar_lea.hbm %s278_s16, 128  ;;  %s548_s29 = scalar_lea.hbm %s804_s2, 256 }
  0xe1   : > { %p545_p5 = scmp.ne.s32.totalorder %s278_s16, %s544_s27  ;;  %p549_p4 = scmp.lt.s32.totalorder %s278_s16, %s804_s2 }
  0xe2   : > { %p550_p10 = scmp.lt.s32.totalorder %s548_s29, %s544_s27 }
  0xe3   : > { %p546_p7 = pnand %p545_p5, %p723_p0 }
  0xe4   : > { %p551_p9 = por %p550_p10, %p549_p4 }
  0xe5   : > { %p547_p6 = pneg %p546_p7 }
  0xe7   : > { %p552_p1 = pnand %p551_p9, %p547_p6 }
  0xe9   : > { %555 = shalt.err (!%p552_p1)
}
  0xea   : > { %399 = dma.vmem_to_hbm [thread:$0]  (%p723_p0), %s281_s21, 128, %s278_s16, %s264_s22  }
  0xeb PF: > { %s292_s6 = sand.u32 1, %s594_s9   ;;  %p815_p8 = scmp.ne.s32.totalorder %s809_s20, 0 }
  0xec   : > { %p816_p13 = scmp.ge.s32.totalorder %s614_s14, 2  ;;  %s293_s7 = scalar_lea.sflag [#allocation4], %s292_s6 }
  0xee   : > { %p410_p11 = pnand %p816_p13, %p815_p8 }
  0xf0   : > { %p411_p2 = pneg %p410_p11 }
  0xf2   : > { %589 = dma.done.wait (%p411_p2), %s293_s7, 128  }
  0xf3   : > { %591 = vsyncadd (%p411_p2), %s293_s7, 4294967168  ;;  %s19_s14 = sadd.s32 1, %s614_s14   ;;  %s817_s9 = smov %s598_s10 }
  0xf4   : > { %p16_p12 = scmp.ge.s32.totalorder %s19_s14, 4   ;;  %s818_s10 = smov %s602_s11 }
  0xf5   : > { %s819_s11 = smov %s729_s5  ;;  %s820_s12 = smov %s610_s13 }
  0xf6   : > { %s821_s13 = smov %s823_s25  ;;  %18 = sbr.rel (!%p16_p12) target bundleno = 7 (0x7), region = 77 }
  0xfb   :  { %298 = vsyncpa [#allocation3], 1 }
  0xfc   :  { %300 = vsyncpa [#allocation3 + $0x1], 1 }
  0xfd   :  { %301 = vsyncpa [#allocation6], 1 }
  0xfe   :  { %302 = vsyncpa [#allocation4], 1 }
  0xff   :  { %304 = vsyncpa [#allocation4 + $0x1], 1 }

</bundles_post_ra>
